<compile_context>
chip_gen: v5e
topology: v5e:2x2
jax: 0.10.0
libtpu: 0.0.40
codegen_flags: <defaults>
</compile_context>

<pallas_src>
import functools

import jax
import jax.numpy as jnp
from jax.experimental import pallas as pl
from jax.experimental.pallas import tpu as pltpu

_LANE = 128      # last-dim (lane) alignment
_SUBLANE = 8     # f32 sublane alignment for the batch tile


def _round_up(n, m):
    return (n + m - 1) // m * m


def _cdiv(a, b):
    return (a + b - 1) // b


def _pad2d(a, rows, cols):
    r, c = a.shape
    if r == rows and c == cols:
        return a
    return jnp.pad(a, ((0, rows - r), (0, cols - c)))


def _tpu_budget():
    """Generation-aware (vmem_limit_bytes, max_batch_tile, per-block budget)."""
    vmem_bytes = 64 * 1024 * 1024  # conservative default = v7x per-TC VMEM
    try:
        info = pltpu.get_tpu_info()
        vmem_bytes = int(getattr(info, "vmem_capacity_bytes", vmem_bytes))
    except Exception:
        pass
    if vmem_bytes >= 100 * 1024 * 1024:
        # v5e / v6e: 128 MiB VMEM -> bigger batch tile, generous scoped limit.
        return 96 * 1024 * 1024, 512, 10 * 1024 * 1024
    # v7x: 64 MiB physical VMEM per TensorCore -> stay well under it.
    return 44 * 1024 * 1024, 256, 6 * 1024 * 1024


_VMEM_LIMIT, _MAX_TB, _BLOCK_BUDGET = _tpu_budget()


# ---------------------------------------------------------------------------
# Kernels.  grid = (n_batch_tiles, n_d_tiles); batch axis "parallel",
# D-reduction axis "arbitrary" with an f32 VMEM accumulator scratch.
# ---------------------------------------------------------------------------
def _accumulate_w1(x_ref, w1_ref, acc_ref):
    """acc += bf16(x_tile) @ W1_tile with f32 MXU accumulation."""
    kd = pl.program_id(1)

    @pl.when(kd == 0)
    def _():
        acc_ref[...] = jnp.zeros_like(acc_ref)

    acc_ref[...] += jnp.dot(x_ref[...].astype(jnp.bfloat16), w1_ref[...],
                            preferred_element_type=jnp.float32)


def _is_last_d():
    return pl.program_id(1) == pl.num_programs(1) - 1


def _kernel_out(x_ref, w1_ref, b1_ref, w2_ref, b2_ref, out_ref, acc_ref):
    """returnt == 'out': skip the (B, F) features HBM writeback."""
    _accumulate_w1(x_ref, w1_ref, acc_ref)

    @pl.when(_is_last_d())
    def _():
        feat = jnp.maximum(acc_ref[...] + b1_ref[...], jnp.float32(0.0))
        out_ref[...] = (jnp.dot(feat.astype(jnp.bfloat16), w2_ref[...],
                                preferred_element_type=jnp.float32)
                        + b2_ref[...])


def _kernel_features(x_ref, w1_ref, b1_ref, feat_ref, acc_ref):
    """returnt == 'features': no W2/b2 loads, no second matmul, no logits."""
    _accumulate_w1(x_ref, w1_ref, acc_ref)

    @pl.when(_is_last_d())
    def _():
        feat_ref[...] = jnp.maximum(acc_ref[...] + b1_ref[...], jnp.float32(0.0))


def _kernel_all(x_ref, w1_ref, b1_ref, w2_ref, b2_ref, out_ref, feat_ref, acc_ref):
    """returnt == 'all': write both features and logits."""
    _accumulate_w1(x_ref, w1_ref, acc_ref)

    @pl.when(_is_last_d())
    def _():
        feat = jnp.maximum(acc_ref[...] + b1_ref[...], jnp.float32(0.0))
        feat_ref[...] = feat
        out_ref[...] = (jnp.dot(feat.astype(jnp.bfloat16), w2_ref[...],
                                preferred_element_type=jnp.float32)
                        + b2_ref[...])


# ---------------------------------------------------------------------------
# pallas_call construction.
# ---------------------------------------------------------------------------
def _invariant_spec(block_shape, index_map):
    """Grid-invariant operand -> single VMEM buffer (double-buffering wastes VMEM)."""
    try:
        return pl.BlockSpec(block_shape, index_map, pipeline_mode=pl.Buffered(1))
    except (TypeError, ValueError):
        return pl.BlockSpec(block_shape, index_map)


def _pick_td(d_p, f_p, tb, budget_bytes):
    """Largest D-tile that divides d_p, is a multiple of 128, and keeps both the
    bf16 W1 block and the f32 x block within the per-block VMEM budget."""
    n_chunks = d_p // _LANE
    for n_d in range(1, n_chunks + 1):
        if n_chunks % n_d:
            continue
        td = d_p // n_d
        if td * f_p * 2 <= budget_bytes and td * tb * 4 <= budget_bytes:
            return td
    return _LANE


def _make_call(returnt, tb, td, d_p, f_p, k_p, b_p, n_b, n_d):
    x_spec = pl.BlockSpec((tb, td), lambda i, k: (i, k))      # f32 activations
    w1_spec = pl.BlockSpec((td, f_p), lambda i, k: (k, 0))    # bf16, tiled over D
    b1_spec = _invariant_spec((1, f_p), lambda i, k: (0, 0))
    w2_spec = _invariant_spec((f_p, k_p), lambda i, k: (0, 0))
    b2_spec = _invariant_spec((1, k_p), lambda i, k: (0, 0))

    out_spec = pl.BlockSpec((tb, k_p), lambda i, k: (i, 0))
    feat_spec = pl.BlockSpec((tb, f_p), lambda i, k: (i, 0))
    out_sds = jax.ShapeDtypeStruct((b_p, k_p), jnp.float32)
    feat_sds = jax.ShapeDtypeStruct((b_p, f_p), jnp.float32)

    if returnt == "out":
        kernel = _kernel_out
        in_specs = [x_spec, w1_spec, b1_spec, w2_spec, b2_spec]
        out_shape, out_specs = out_sds, out_spec
        out_bytes = b_p * k_p * 4
        second_matmul = True
    elif returnt == "features":
        kernel = _kernel_features
        in_specs = [x_spec, w1_spec, b1_spec]
        out_shape, out_specs = feat_sds, feat_spec
        out_bytes = b_p * f_p * 4
        second_matmul = False
    else:  # 'all'
        kernel = _kernel_all
        in_specs = [x_spec, w1_spec, b1_spec, w2_spec, b2_spec]
        out_shape = (out_sds, feat_sds)
        out_specs = [out_spec, feat_spec]
        out_bytes = b_p * (k_p + f_p) * 4
        second_matmul = True

    flops = 2 * b_p * d_p * f_p + (2 * b_p * f_p * k_p if second_matmul else 0)
    bytes_accessed = (b_p * d_p * 4                       # f32 x stream
                      + n_b * d_p * f_p * 2               # bf16 W1 per batch tile
                      + (f_p * k_p * 2 + (f_p + k_p) * 4 if second_matmul
                         else f_p * 4)
                      + out_bytes)

    return pl.pallas_call(
        kernel,
        out_shape=out_shape,
        grid_spec=pltpu.PrefetchScalarGridSpec(
            num_scalar_prefetch=0,
            grid=(n_b, n_d),
            in_specs=in_specs,
            out_specs=out_specs,
            scratch_shapes=[pltpu.VMEM((tb, f_p), jnp.float32)],
        ),
        compiler_params=pltpu.CompilerParams(
            dimension_semantics=("parallel", "arbitrary"),
            vmem_limit_bytes=_VMEM_LIMIT),
        cost_estimate=pl.CostEstimate(
            flops=flops, transcendentals=0, bytes_accessed=bytes_accessed),
    )


# ---------------------------------------------------------------------------
# Host-side wrapper (flatten; pad only when unaligned; bf16 weights only).
# ---------------------------------------------------------------------------
@functools.partial(jax.jit, static_argnames=("returnt",))
def backbone_forward(x_nchw, params, returnt="out"):
    """x_nchw: (B, C, H, W) float32, PyTorch layout."""
    if returnt not in ("out", "features", "all"):
        raise ValueError(f"unknown returnt: {returnt}")

    w1, b1, w2, b2 = params["w1"], params["b1"], params["w2"], params["b2"]
    B = x_nchw.shape[0]
    D, F = w1.shape
    K = w2.shape[1]

    # Lane-dense feature/class dims (padded with zeros -> no contamination).
    d_p = _round_up(D, _LANE)
    f_p = _round_up(F, _LANE)
    k_p = _round_up(K, _LANE)

    # Batch tiling: pad only to the f32 sublane, never to the tile size.
    b_p = _round_up(B, _SUBLANE)
    if b_p <= _SUBLANE:
        tb = b_p
    else:
        # >= 2 tiles so the "parallel" batch axis shards across both v7x TCs.
        tb = min(_MAX_TB, _round_up(_cdiv(b_p, 2), _SUBLANE))
    n_b = _cdiv(b_p, tb)

    td = _pick_td(d_p, f_p, tb, _BLOCK_BUDGET)
    n_d = d_p // td

    # x stays f32 (bf16 cast happens in-kernel); it is only touched here when
    # B or D are not already tile-aligned.  Weights are cast to bf16 once and
    # reused across every batch tile.
    x_flat = x_nchw.reshape(B, D)
    x_p = _pad2d(x_flat, b_p, d_p)
    w1_p = _pad2d(w1.astype(jnp.bfloat16), d_p, f_p)
    b1_p = _pad2d(b1.astype(jnp.float32).reshape(1, -1), 1, f_p)
    w2_p = _pad2d(w2.astype(jnp.bfloat16), f_p, k_p)
    b2_p = _pad2d(b2.astype(jnp.float32).reshape(1, -1), 1, k_p)

    call = _make_call(returnt, tb, td, d_p, f_p, k_p, b_p, n_b, n_d)

    if returnt == "out":
        out_p = call(x_p, w1_p, b1_p, w2_p, b2_p)
        return out_p[:B, :K]
    if returnt == "features":
        feat_p = call(x_p, w1_p, b1_p)
        return feat_p[:B, :F]
    out_p, feat_p = call(x_p, w1_p, b1_p, w2_p, b2_p)
    return out_p[:B, :K], feat_p[:B, :F]


# ---------------------------------------------------------------------------
# Parameter helpers (Backbone.get_params / set_params analogues).
# ---------------------------------------------------------------------------
def init_backbone_params(key, in_dim, feat_dim, num_classes):
    """Deterministic parameter init (nn.Linear shapes, stored (in, out))."""
    k1, k2 = jax.random.split(key)
    scale1 = 1.0 / jnp.sqrt(jnp.float32(in_dim))
    scale2 = 1.0 / jnp.sqrt(jnp.float32(feat_dim))
    return {
        "w1": jax.random.uniform(k1, (in_dim, feat_dim), jnp.float32, -scale1, scale1),
        "b1": jnp.zeros((1, feat_dim), jnp.float32),
        "w2": jax.random.uniform(k2, (feat_dim, num_classes), jnp.float32, -scale2, scale2),
        "b2": jnp.zeros((1, num_classes), jnp.float32),
    }


def get_params(params):
    """All parameters concatenated in a single 1-D tensor (Backbone.get_params)."""
    leaves = jax.tree_util.tree_leaves(params)
    return jnp.concatenate([p.reshape(-1) for p in leaves])


def set_params(params, new_flat):
    """Scatter a flat vector back into the parameter pytree (Backbone.set_params)."""
    leaves, treedef = jax.tree_util.tree_flatten(params)
    assert new_flat.size == sum(p.size for p in leaves)
    new_leaves, off = [], 0
    for p in leaves:
        n = p.size
        new_leaves.append(new_flat[off:off + n].reshape(p.shape).astype(p.dtype))
        off += n
    return jax.tree_util.tree_unflatten(treedef, new_leaves)


if __name__ == "__main__":
    # Small, forward-consistent shapes: NCHW input (batch=2, channels=4, 16x16).
    B, C, H, W = 2, 4, 16, 16
    FEAT_DIM, NUM_CLASSES = 32, 10
    IN_DIM = C * H * W

    key = jax.random.PRNGKey(0)
    kx, kp = jax.random.split(key)
    x = jax.random.normal(kx, (B, C, H, W), dtype=jnp.float32)
    params = init_backbone_params(kp, IN_DIM, FEAT_DIM, NUM_CLASSES)

    # Run the fused Pallas kernel in all three return modes.
    out = backbone_forward(x, params, returnt="out")
    feat = backbone_forward(x, params, returnt="features")
    out_all, feat_all = backbone_forward(x, params, returnt="all")
    jax.block_until_ready((out, feat, out_all, feat_all))

    # Pure-JAX reference mirroring kernel math (bf16 operands, f32 accumulation).
    x_flat = x.reshape(B, -1)
    x_bf = x_flat.astype(jnp.bfloat16)
    w1_bf = params["w1"].astype(jnp.bfloat16)
    w2_bf = params["w2"].astype(jnp.bfloat16)
    feat_ref = jnp.maximum(
        jnp.dot(x_bf, w1_bf, preferred_element_type=jnp.float32) + params["b1"], 0.0)
    out_ref = jnp.dot(feat_ref.astype(jnp.bfloat16), w2_bf,
                      preferred_element_type=jnp.float32) + params["b2"]

    assert out.shape == (B, NUM_CLASSES) and feat.shape == (B, FEAT_DIM)
    assert jnp.allclose(out, out_ref, atol=2e-3, rtol=2e-3)
    assert jnp.allclose(feat, feat_ref, atol=2e-3, rtol=2e-3)
    assert jnp.allclose(out_all, out, atol=1e-5)
    assert jnp.allclose(feat_all, feat, atol=1e-5)

    # Exercise the param-vector helpers (get_params / set_params round trip).
    flat = get_params(params)
    params_rt = set_params(params, flat)
    out_rt = backbone_forward(x, params_rt, returnt="out")
    jax.block_until_ready(out_rt)
    assert jnp.allclose(out_rt, out, atol=1e-5)

    print("KERNEL_OK")
</pallas_src>

<mosaic_0001>
module attributes {stable_mosaic.version = 11 : i64} {
  func.func @_kernel_out(%arg0: i32, %arg1: i32, %arg2: memref<8x1024xf32, #tpu.memory_space<vmem>>, %arg3: memref<1024x128xbf16, #tpu.memory_space<vmem>>, %arg4: memref<1x128xf32, #tpu.memory_space<vmem>>, %arg5: memref<128x128xbf16, #tpu.memory_space<vmem>>, %arg6: memref<1x128xf32, #tpu.memory_space<vmem>>, %arg7: memref<8x128xf32, #tpu.memory_space<vmem>>, %arg8: memref<8x128xf32, #tpu.memory_space<vmem>>) attributes {dimension_semantics = [#tpu.dimension_semantics<parallel>, #tpu.dimension_semantics<arbitrary>], iteration_bounds = array<i64: 1, 1>, scalar_prefetch = 0 : i64, scratch_operands = 1 : i64, tpu.core_type = #tpu.core_type<tc>, window_params = [{transform_indices = @transform_0, window_bounds = array<i64: 8, 1024>}, {transform_indices = @transform_1, window_bounds = array<i64: 1024, 128>}, {pipeline_mode = #tpu.pipeline_mode<synchronous>, transform_indices = @transform_2, window_bounds = array<i64: 1, 128>}, {pipeline_mode = #tpu.pipeline_mode<synchronous>, transform_indices = @transform_3, window_bounds = array<i64: 128, 128>}, {pipeline_mode = #tpu.pipeline_mode<synchronous>, transform_indices = @transform_4, window_bounds = array<i64: 1, 128>}, {transform_indices = @transform_5, window_bounds = array<i64: 8, 128>}]} {
    %c0_i32 = arith.constant 0 : i32
    %0 = arith.cmpi eq, %arg1, %c0_i32 : i32
    %1 = arith.extui %0 : i1 to i32
    %c0_i32_0 = arith.constant 0 : i32
    %2 = arith.cmpi ne, %1, %c0_i32_0 : i32
    scf.if %2 {
      %cst_10 = arith.constant 0.000000e+00 : f32
      %13 = vector.broadcast %cst_10 : f32 to vector<8x128xf32>
      %c0_11 = arith.constant 0 : index
      %c0_12 = arith.constant 0 : index
      %14 = vector.load %arg8[%c0_11, %c0_12] : memref<8x128xf32, #tpu.memory_space<vmem>>, vector<8x128xf32>
      tpu.vector_store %arg8[%c0_11, %c0_12], %13 {strides = array<i32>} : memref<8x128xf32, #tpu.memory_space<vmem>>, vector<8x128xf32>,
    } else {
    }
    %c0 = arith.constant 0 : index
    %c0_1 = arith.constant 0 : index
    %3 = vector.load %arg8[%c0, %c0_1] : memref<8x128xf32, #tpu.memory_space<vmem>>, vector<8x128xf32>
    %c0_2 = arith.constant 0 : index
    %c0_3 = arith.constant 0 : index
    %4 = vector.load %arg2[%c0_2, %c0_3] : memref<8x1024xf32, #tpu.memory_space<vmem>>, vector<8x1024xf32>
    %5 = arith.truncf %4 : vector<8x1024xf32> to vector<8x1024xbf16>
    %c0_4 = arith.constant 0 : index
    %c0_5 = arith.constant 0 : index
    %6 = vector.load %arg3[%c0_4, %c0_5] : memref<1024x128xbf16, #tpu.memory_space<vmem>>, vector<1024x128xbf16>
    %cst = arith.constant dense<0.000000e+00> : vector<8x128xf32>
    %7 = tpu.matmul %5, %6, %cst {dimension_numbers = #tpu.dot_dimension_numbers<[1], [0], [0], [1], [0, 0, 1, 1], [], []>} : vector<8x1024xbf16>, vector<1024x128xbf16>, vector<8x128xf32> -> vector<8x128xf32>
    %8 = arith.addf %3, %7 : vector<8x128xf32>
    %c0_6 = arith.constant 0 : index
    %c0_7 = arith.constant 0 : index
    %9 = vector.load %arg8[%c0_6, %c0_7] : memref<8x128xf32, #tpu.memory_space<vmem>>, vector<8x128xf32>
    tpu.vector_store %arg8[%c0_6, %c0_7], %8 {strides = array<i32>} : memref<8x128xf32, #tpu.memory_space<vmem>>, vector<8x128xf32>,
    %c0_i32_8 = arith.constant 0 : i32
    %10 = arith.cmpi eq, %arg1, %c0_i32_8 : i32
    %11 = arith.extui %10 : i1 to i32
    %c0_i32_9 = arith.constant 0 : i32
    %12 = arith.cmpi ne, %11, %c0_i32_9 : i32
    scf.if %12 {
      %c0_10 = arith.constant 0 : index
      %c0_11 = arith.constant 0 : index
      %13 = vector.load %arg8[%c0_10, %c0_11] : memref<8x128xf32, #tpu.memory_space<vmem>>, vector<8x128xf32>
      %c0_12 = arith.constant 0 : index
      %c0_13 = arith.constant 0 : index
      %14 = vector.load %arg4[%c0_12, %c0_13] : memref<1x128xf32, #tpu.memory_space<vmem>>, vector<1x128xf32>
      %15 = vector.broadcast %14 : vector<1x128xf32> to vector<8x128xf32>
      %16 = arith.addf %13, %15 : vector<8x128xf32>
      %cst_14 = arith.constant 0.000000e+00 : f32
      %17 = vector.broadcast %cst_14 : f32 to vector<8x128xf32>
      %18 = arith.maximumf %16, %17 : vector<8x128xf32>
      %19 = arith.truncf %18 : vector<8x128xf32> to vector<8x128xbf16>
      %c0_15 = arith.constant 0 : index
      %c0_16 = arith.constant 0 : index
      %20 = vector.load %arg5[%c0_15, %c0_16] : memref<128x128xbf16, #tpu.memory_space<vmem>>, vector<128x128xbf16>
      %cst_17 = arith.constant dense<0.000000e+00> : vector<8x128xf32>
      %21 = tpu.matmul %19, %20, %cst_17 {dimension_numbers = #tpu.dot_dimension_numbers<[1], [0], [0], [1], [0, 0, 1, 1], [], []>} : vector<8x128xbf16>, vector<128x128xbf16>, vector<8x128xf32> -> vector<8x128xf32>
      %c0_18 = arith.constant 0 : index
      %c0_19 = arith.constant 0 : index
      %22 = vector.load %arg6[%c0_18, %c0_19] : memref<1x128xf32, #tpu.memory_space<vmem>>, vector<1x128xf32>
      %23 = vector.broadcast %22 : vector<1x128xf32> to vector<8x128xf32>
      %24 = arith.addf %21, %23 : vector<8x128xf32>
      %c0_20 = arith.constant 0 : index
      %c0_21 = arith.constant 0 : index
      %25 = vector.load %arg7[%c0_20, %c0_21] : memref<8x128xf32, #tpu.memory_space<vmem>>, vector<8x128xf32>
      tpu.vector_store %arg7[%c0_20, %c0_21], %24 {strides = array<i32>} : memref<8x128xf32, #tpu.memory_space<vmem>>, vector<8x128xf32>,
    } else {
    }
    return
  }
  func.func @transform_0(%arg0: i32, %arg1: i32) -> (i32, i32) {
    %c0_i32 = arith.constant 0 : i32
    return %arg0, %arg1 : i32, i32
  }
  func.func @transform_1(%arg0: i32, %arg1: i32) -> (i32, i32) {
    %c0_i32 = arith.constant 0 : i32
    %c0_i32_0 = arith.constant 0 : i32
    return %arg1, %c0_i32 : i32, i32
  }
  func.func @transform_2(%arg0: i32, %arg1: i32) -> (i32, i32) {
    %c0_i32 = arith.constant 0 : i32
    %c0_i32_0 = arith.constant 0 : i32
    %c0_i32_1 = arith.constant 0 : i32
    return %c0_i32, %c0_i32_0 : i32, i32
  }
  func.func @transform_3(%arg0: i32, %arg1: i32) -> (i32, i32) {
    %c0_i32 = arith.constant 0 : i32
    %c0_i32_0 = arith.constant 0 : i32
    %c0_i32_1 = arith.constant 0 : i32
    return %c0_i32, %c0_i32_0 : i32, i32
  }
  func.func @transform_4(%arg0: i32, %arg1: i32) -> (i32, i32) {
    %c0_i32 = arith.constant 0 : i32
    %c0_i32_0 = arith.constant 0 : i32
    %c0_i32_1 = arith.constant 0 : i32
    return %c0_i32, %c0_i32_0 : i32, i32
  }
  func.func @transform_5(%arg0: i32, %arg1: i32) -> (i32, i32) {
    %c0_i32 = arith.constant 0 : i32
    %c0_i32_0 = arith.constant 0 : i32
    return %arg0, %c0_i32 : i32, i32
  }
}

</mosaic_0001>

<bundles_post_ra>
// kernel: backbone_forward.1
= control target key start
LH: loop header
LB: loop body
LE: loop exit
PB: predicated region body
PF: predicated region fallthrough
CT: control target
= control target key end

     0   :  { %s1398_s1 = inlined_call_operand.vmem [shape: bf16[1024,128], index: 1, kind: input, shape index: {}]   ;;  %s1399_s0 = inlined_call_operand.vmem [shape: f32[8,1024], index: 0, kind: input, shape index: {}]   ;;  %s1400_s2 = inlined_call_operand.vmem [shape: f32[1,128], index: 2, kind: input, shape index: {}]   ;;  %s1401_s4 = inlined_call_operand.vmem [shape: f32[1,128], index: 4, kind: input, shape index: {}]   ;;  %s1402_s3 = inlined_call_operand.vmem [shape: bf16[128,128], index: 3, kind: input, shape index: {}]   ;;  %s1403_s5 = inlined_call_operand.vmem [shape: f32[8,128], index: 5, kind: output, shape index: {}]  }
   0x1   :  { %v1052_v0 = vld [vmem:[%s1398_s1 + $0x38] sm:$0xff]  ;;  %v1051_v4 = vld [vmem:[%s1398_s1 + $0x30] sm:$0xff]  ;;  %v1050_v8 = vld [vmem:[%s1398_s1 + $0x28] sm:$0xff] }
   0x2   :  { %v1060_v1 = vld [vmem:[%s1398_s1 + $0x78] sm:$0xff]  ;;  %554 = vmatpush.bf16.msra.mxu0 %v1052_v0  ;;  %v1059_v5 = vld [vmem:[%s1398_s1 + $0x70] sm:$0xff]  ;;  %v1058_v9 = vld [vmem:[%s1398_s1 + $0x68] sm:$0xff] }
   0x3   :  { %v1068_v2 = vld [vmem:[%s1398_s1 + $0xb8] sm:$0xff]  ;;  %567 = vmatpush.bf16.msra.mxu1 %v1060_v1  ;;  %v1067_v6 = vld [vmem:[%s1398_s1 + $0xb0] sm:$0xff]  ;;  %v1066_v10 = vld [vmem:[%s1398_s1 + $0xa8] sm:$0xff] }
   0x4   :  { %v1076_v3 = vld [vmem:[%s1398_s1 + $0xf8] sm:$0xff]  ;;  %580 = vmatpush.bf16.msra.mxu2 %v1068_v2  ;;  %v1075_v7 = vld [vmem:[%s1398_s1 + $0xf0] sm:$0xff]  ;;  %v1074_v11 = vld [vmem:[%s1398_s1 + $0xe8] sm:$0xff] }
   0x5   :  { %593 = vmatpush.bf16.msra.mxu3 %v1076_v3  ;;  %v1049_v12 = vld [vmem:[%s1398_s1 + $0x20] sm:$0xff]  ;;  %v1048_v16 = vld [vmem:[%s1398_s1 + $0x18] sm:$0xff]  ;;  %v1047_v20 = vld [vmem:[%s1398_s1 + $0x10] sm:$0xff] }
   0x6   :  { %555 = vmatpush.bf16.msra.mxu0 %v1051_v4  ;;  %v1057_v13 = vld [vmem:[%s1398_s1 + $0x60] sm:$0xff]  ;;  %v1056_v17 = vld [vmem:[%s1398_s1 + $0x58] sm:$0xff]  ;;  %v1055_v21 = vld [vmem:[%s1398_s1 + $0x50] sm:$0xff] }
   0x7   :  { %568 = vmatpush.bf16.msra.mxu1 %v1059_v5  ;;  %v1065_v14 = vld [vmem:[%s1398_s1 + $0xa0] sm:$0xff]  ;;  %v1064_v18 = vld [vmem:[%s1398_s1 + $0x98] sm:$0xff]  ;;  %v1063_v22 = vld [vmem:[%s1398_s1 + $0x90] sm:$0xff] }
   0x8   :  { %581 = vmatpush.bf16.msra.mxu2 %v1067_v6  ;;  %v1073_v15 = vld [vmem:[%s1398_s1 + $0xe0] sm:$0xff]  ;;  %v1072_v19 = vld [vmem:[%s1398_s1 + $0xd8] sm:$0xff]  ;;  %v1071_v23 = vld [vmem:[%s1398_s1 + $0xd0] sm:$0xff] }
   0x9   :  { %594 = vmatpush.bf16.msra.mxu3 %v1075_v7  ;;  %v1046_v24 = vld [vmem:[%s1398_s1 + $0x8] sm:$0xff]  ;;  %v1045_v28 = vld [vmem:[%s1398_s1] sm:$0xff]  ;;  %v1084_v32 = vld [vmem:[%s1398_s1 + $0x138] sm:$0xff] }
   0xa   :  { %556 = vmatpush.bf16.msra.mxu0 %v1050_v8  ;;  %v1054_v25 = vld [vmem:[%s1398_s1 + $0x48] sm:$0xff]  ;;  %v1053_v29 = vld [vmem:[%s1398_s1 + $0x40] sm:$0xff]  ;;  %v28_v33 = vld [vmem:[%s1399_s0 + $0x10] sm:$0xff] }
   0xb   :  { %569 = vmatpush.bf16.msra.mxu1 %v1058_v9  ;;  %v1062_v26 = vld [vmem:[%s1398_s1 + $0x88] sm:$0xff]  ;;  %v1061_v30 = vld [vmem:[%s1398_s1 + $0x80] sm:$0xff]  ;;  %v1092_v35 = vld [vmem:[%s1398_s1 + $0x178] sm:$0xff]  ;;  %v36_v40 = vpack.c.bf16 %v28_v33, %v28_v33 }
   0xc   :  { %582 = vmatpush.bf16.msra.mxu2 %v1066_v10  ;;  %v1070_v27 = vld [vmem:[%s1398_s1 + $0xc8] sm:$0xff]  ;;  %v1069_v31 = vld [vmem:[%s1398_s1 + $0xc0] sm:$0xff]  ;;  %v29_v36 = vld [vmem:[%s1399_s0 + $0x18] sm:$0xff] }
   0xd   :  { %595 = vmatpush.bf16.msra.mxu3 %v1074_v11  ;;  %v26_v34 = vld [vmem:[%s1399_s0] sm:$0xff]  ;;  %v27_v37 = vld [vmem:[%s1399_s0 + $0x8] sm:$0xff]  ;;  %v1100_v38 = vld [vmem:[%s1398_s1 + $0x1b8] sm:$0xff]  ;;  %v37_v42 = vpack.c.bf16 %v29_v36, %v29_v36 }
   0xe   :  { %557 = vmatpush.bf16.msra.mxu0 %v1049_v12  ;;  %v1108_v39 = vld [vmem:[%s1398_s1 + $0x1f8] sm:$0xff]  ;;  %v34_v41 = vpack.c.bf16 %v26_v34, %v26_v34  ;;  %v35_v43 = vpack.c.bf16 %v27_v37, %v27_v37  ;;  %v1083_v44 = vld [vmem:[%s1398_s1 + $0x130] sm:$0xff]  ;;  %v1082_v48 = vld [vmem:[%s1398_s1 + $0x128] sm:$0xff] }
   0xf   :  { %570 = vmatpush.bf16.msra.mxu1 %v1057_v13  ;;  %v1091_v45 = vld [vmem:[%s1398_s1 + $0x170] sm:$0xff]  ;;  %v1090_v49 = vld [vmem:[%s1398_s1 + $0x168] sm:$0xff]  ;;  %v1081_v52 = vld [vmem:[%s1398_s1 + $0x120] sm:$0xff] }
  0x10   :  { %583 = vmatpush.bf16.msra.mxu2 %v1065_v14  ;;  %v1099_v46 = vld [vmem:[%s1398_s1 + $0x1b0] sm:$0xff]  ;;  %v1098_v50 = vld [vmem:[%s1398_s1 + $0x1a8] sm:$0xff]  ;;  %v1089_v53 = vld [vmem:[%s1398_s1 + $0x160] sm:$0xff] }
  0x11   :  { %596 = vmatpush.bf16.msra.mxu3 %v1073_v15  ;;  %v1107_v47 = vld [vmem:[%s1398_s1 + $0x1f0] sm:$0xff]  ;;  %v1106_v51 = vld [vmem:[%s1398_s1 + $0x1e8] sm:$0xff]  ;;  %v1097_v54 = vld [vmem:[%s1398_s1 + $0x1a0] sm:$0xff] }
  0x12   :  { %558 = vmatpush.bf16.msra.mxu0 %v1048_v16  ;;  %v1105_v55 = vld [vmem:[%s1398_s1 + $0x1e0] sm:$0xff]  ;;  %v1080_v56 = vld [vmem:[%s1398_s1 + $0x118] sm:$0xff]  ;;  %v1079_v60 = vld [vmem:[%s1398_s1 + $0x110] sm:$0xff] }
  0x13   :  { %571 = vmatpush.bf16.msra.mxu1 %v1056_v17  ;;  %v1088_v57 = vld [vmem:[%s1398_s1 + $0x158] sm:$0xff]  ;;  %v1087_v61 = vld [vmem:[%s1398_s1 + $0x150] sm:$0xff]  ;;  %v1078_v0 = vld [vmem:[%s1398_s1 + $0x108] sm:$0xff] }
  0x14   :  { %584 = vmatpush.bf16.msra.mxu2 %v1064_v18  ;;  %v1096_v58 = vld [vmem:[%s1398_s1 + $0x198] sm:$0xff]  ;;  %v1095_v62 = vld [vmem:[%s1398_s1 + $0x190] sm:$0xff]  ;;  %v1086_v1 = vld [vmem:[%s1398_s1 + $0x148] sm:$0xff] }
  0x15   :  { %597 = vmatpush.bf16.msra.mxu3 %v1072_v19  ;;  %v1104_v59 = vld [vmem:[%s1398_s1 + $0x1d8] sm:$0xff]  ;;  %v1103_v63 = vld [vmem:[%s1398_s1 + $0x1d0] sm:$0xff]  ;;  %v1094_v2 = vld [vmem:[%s1398_s1 + $0x188] sm:$0xff] }
  0x16   :  { %559 = vmatpush.bf16.msra.mxu0 %v1047_v20  ;;  %v1102_v3 = vld [vmem:[%s1398_s1 + $0x1c8] sm:$0xff]  ;;  %v1077_v4 = vld [vmem:[%s1398_s1 + $0x100] sm:$0xff]  ;;  %v32_v10 = vld [vmem:[%s1399_s0 + $0x30] sm:$0xff] }
  0x17   :  { %572 = vmatpush.bf16.msra.mxu1 %v1055_v21  ;;  %v1085_v5 = vld [vmem:[%s1398_s1 + $0x140] sm:$0xff]  ;;  %v31_v8 = vld [vmem:[%s1399_s0 + $0x28] sm:$0xff]  ;;  %v33_v11 = vld [vmem:[%s1399_s0 + $0x38] sm:$0xff]  ;;  %v40_v14 = vpack.c.bf16 %v32_v10, %v32_v10 }
  0x18   :  { %585 = vmatpush.bf16.msra.mxu2 %v1063_v22  ;;  %v1093_v6 = vld [vmem:[%s1398_s1 + $0x180] sm:$0xff]  ;;  %v39_v13 = vpack.c.bf16 %v31_v8, %v31_v8  ;;  %v41_v15 = vpack.c.bf16 %v33_v11, %v33_v11  ;;  %v1116_v16 = vld [vmem:[%s1402_s3 + $0x38] sm:$0xff]  ;;  %v1115_v17 = vld [vmem:[%s1402_s3 + $0x30] sm:$0xff] }
  0x19   :  { %598 = vmatpush.bf16.msra.mxu3 %v1071_v23  ;;  %v30_v7 = vld [vmem:[%s1399_s0 + $0x20] sm:$0xff]  ;;  %v1114_v18 = vld [vmem:[%s1402_s3 + $0x28] sm:$0xff]  ;;  %v1112_v20 = vld [vmem:[%s1402_s3 + $0x18] sm:$0xff] }
  0x1a   :  { %560 = vmatpush.bf16.msra.mxu0 %v1046_v24  ;;  %v1101_v9 = vld [vmem:[%s1398_s1 + $0x1c0] sm:$0xff]  ;;  %v38_v12 = vpack.c.bf16 %v30_v7, %v30_v7  ;;  %v1111_v23 = vld [vmem:[%s1402_s3 + $0x10] sm:$0xff] }
  0x1b   :  { %573 = vmatpush.bf16.msra.mxu1 %v1054_v25  ;;  %v1113_v19 = vld [vmem:[%s1402_s3 + $0x20] sm:$0xff]  ;;  %v1110_v25 = vld [vmem:[%s1402_s3 + $0x8] sm:$0xff] }
  0x1c   :  { %586 = vmatpush.bf16.msra.mxu2 %v1062_v26 }
  0x1d   :  { %599 = vmatpush.bf16.msra.mxu3 %v1070_v27 }
  0x1e   :  { %561 = vmatpush.bf16.msra.mxu0 %v1045_v28 }
  0x1f   :  { %574 = vmatpush.bf16.msra.mxu1 %v1053_v29  ;;  %v1109_v29 = vld [vmem:[%s1402_s3] sm:$0xff] }
  0x20   :  { %587 = vmatpush.bf16.msra.mxu2 %v1061_v30 }
  0x21   :  { %600 = vmatpush.bf16.msra.mxu3 %v1069_v31  ;;  %562 = vmatmul.bf16.vlgmr.msra.gmra.mxu0 %v34_v41 }
  0x22   :  { %606 = vmatpush.bf16.msrb.mxu0 %v1084_v32  ;;  %575 = vmatmul.bf16.vlgmr.msra.gmra.mxu1 %v35_v43 }
  0x23   :  { %619 = vmatpush.bf16.msrb.mxu1 %v1092_v35  ;;  %588 = vmatmul.bf16.vlgmr.msra.gmra.mxu2 %v36_v40 }
  0x24   :  { %632 = vmatpush.bf16.msrb.mxu2 %v1100_v38  ;;  %601 = vmatmul.bf16.vlgmr.msra.gmra.mxu3 %v37_v42  ;;  %v1117_v42 = vld [vmem:[%s1400_s2] ss:$0 sm:$0xff] }
  0x25   :  { %645 = vmatpush.bf16.msrb.mxu3 %v1108_v39 }
  0x26   :  { %607 = vmatpush.bf16.msrb.mxu0 %v1083_v44 }
  0x27   :  { %620 = vmatpush.bf16.msrb.mxu1 %v1091_v45 }
  0x28   :  { %633 = vmatpush.bf16.msrb.mxu2 %v1099_v46 }
  0x29   :  { %646 = vmatpush.bf16.msrb.mxu3 %v1107_v47 }
  0x2a   :  { %608 = vmatpush.bf16.msrb.mxu0 %v1082_v48 }
  0x2b   :  { %621 = vmatpush.bf16.msrb.mxu1 %v1090_v49 }
  0x2c   :  { %634 = vmatpush.bf16.msrb.mxu2 %v1098_v50 }
  0x2d   :  { %647 = vmatpush.bf16.msrb.mxu3 %v1106_v51  ;;  %v1118_v51 = vld [vmem:[%s1401_s4] ss:$0 sm:$0xff] }
  0x2e   :  { %609 = vmatpush.bf16.msrb.mxu0 %v1081_v52 }
  0x2f   :  { %622 = vmatpush.bf16.msrb.mxu1 %v1089_v53 }
  0x30   :  { %635 = vmatpush.bf16.msrb.mxu2 %v1097_v54 }
  0x31   :  { %648 = vmatpush.bf16.msrb.mxu3 %v1105_v55 }
  0x32   :  { %610 = vmatpush.bf16.msrb.mxu0 %v1080_v56 }
  0x33   :  { %623 = vmatpush.bf16.msrb.mxu1 %v1088_v57 }
  0x34   :  { %636 = vmatpush.bf16.msrb.mxu2 %v1096_v58 }
  0x35   :  { %649 = vmatpush.bf16.msrb.mxu3 %v1104_v59 }
  0x36   :  { %611 = vmatpush.bf16.msrb.mxu0 %v1079_v60 }
  0x37   :  { %624 = vmatpush.bf16.msrb.mxu1 %v1087_v61 }
  0x38   :  { %637 = vmatpush.bf16.msrb.mxu2 %v1095_v62 }
  0x39   :  { %650 = vmatpush.bf16.msrb.mxu3 %v1103_v63 }
  0x3a   :  { %612 = vmatpush.bf16.msrb.mxu0 %v1078_v0 }
  0x3b   :  { %625 = vmatpush.bf16.msrb.mxu1 %v1086_v1 }
  0x3c   :  { %638 = vmatpush.bf16.msrb.mxu2 %v1094_v2 }
  0x3d   :  { %651 = vmatpush.bf16.msrb.mxu3 %v1102_v3 }
  0x3e   :  { %613 = vmatpush.bf16.msrb.mxu0 %v1077_v4 }
  0x3f   :  { %626 = vmatpush.bf16.msrb.mxu1 %v1085_v5 }
  0x40   :  { %639 = vmatpush.bf16.msrb.mxu2 %v1093_v6 }
  0x41   :  { %652 = vmatpush.bf16.msrb.mxu3 %v1101_v9  ;;  %614 = vmatmul.bf16.vlgmr.msrb.gmra.mxu0 %v38_v12 }
  0x42   :  { %627 = vmatmul.bf16.vlgmr.msrb.gmra.mxu1 %v39_v13  ;;  %739 = vmatpush.bf16.msra.mxu0 %v1116_v16 }
  0x43   :  { %640 = vmatmul.bf16.vlgmr.msrb.gmra.mxu2 %v40_v14 }
  0x44   :  { %653 = vmatmul.bf16.vlgmr.msrb.gmra.mxu3 %v41_v15 }
  0x46   :  { %740 = vmatpush.bf16.msra.mxu0 %v1115_v17 }
  0x4a   :  { %741 = vmatpush.bf16.msra.mxu0 %v1114_v18 }
  0x4e   :  { %742 = vmatpush.bf16.msra.mxu0 %v1113_v19 }
  0x52   :  { %743 = vmatpush.bf16.msra.mxu0 %v1112_v20 }
  0x56   :  { %744 = vmatpush.bf16.msra.mxu0 %v1111_v23 }
  0x5a   :  { %745 = vmatpush.bf16.msra.mxu0 %v1110_v25 }
  0x5e   :  { %746 = vmatpush.bf16.msra.mxu0 %v1109_v29 }
  0x9e   :  { %v563_v21 = vpop.f32.mrf.mxu0 }
  0x9f   :  { %v576_v22 = vpop.f32.mrf.mxu1 }
  0xa0   :  { %v577_v32 = vadd.f32 %v576_v22, %v563_v21 }
  0xa6   :  { %v589_v24 = vpop.f32.mrf.mxu2  ;;  %v565_v27 = vpop.f32.mrf.mxu0 }
  0xa7   :  { %v602_v26 = vpop.f32.mrf.mxu3  ;;  %v578_v28 = vpop.f32.mrf.mxu1  ;;  %v590_v33 = vadd.f32 %v589_v24, %v577_v32 }
  0xa9   :  { %v603_v34 = vadd.f32 %v602_v26, %v590_v33 }
  0xae   :  { %v591_v30 = vpop.f32.mrf.mxu2 }
  0xaf   :  { %v604_v31 = vpop.f32.mrf.mxu3 }
  0xbe   :  { %v615_v35 = vpop.f32.mrf.mxu0 }
  0xbf   :  { %v628_v36 = vpop.f32.mrf.mxu1  ;;  %v616_v37 = vadd.f32 %v615_v35, %v603_v34 }
  0xc1   :  { %v629_v38 = vadd.f32 %v628_v36, %v616_v37 }
  0xc6   :  { %v641_v39 = vpop.f32.mrf.mxu2  ;;  %v617_v43 = vpop.f32.mrf.mxu0 }
  0xc7   :  { %v654_v40 = vpop.f32.mrf.mxu3  ;;  %v642_v41 = vadd.f32 %v641_v39, %v629_v38  ;;  %v630_v44 = vpop.f32.mrf.mxu1 }
  0xc9   :  { %v655_v45 = vadd.f32 %v654_v40, %v642_v41 }
  0xcb   :  { %v668_v46 = vadd.f32 %v1117_v42, %v655_v45 }
  0xcd   :  { %v669_v47 = vmax.f32 %v668_v46, 0.0 }
  0xce   :  { %v643_v48 = vpop.f32.mrf.mxu2 }
  0xcf   :  { %v656_v49 = vpop.f32.mrf.mxu3  ;;  %v670_v50 = vpack.c.bf16 %v669_v47, %v669_v47 }
  0xd1   :  { %747 = vmatmul.bf16.vlgmr.msra.gmra.mxu0 %v670_v50 }
 0x14e   :  { %v748_v52 = vpop.f32.mrf.mxu0 }
 0x14f   :  { %v749_v53 = vadd.f32 %v1118_v51, %v748_v52 }
 0x151   :  { %752 = vst [vmem:[%s1403_s5] sm:$0xff] %v749_v53 }
 0x156   :  { %v750_v54 = vpop.f32.mrf.mxu0 }

</bundles_post_ra>
